<compile_context>
chip_gen: v7x
topology: tpu7x:2x2x1
jax: 0.10.0
libtpu: 0.0.40
codegen_flags: <defaults>
</compile_context>

<pallas_src>
import math

import jax
import jax.numpy as jnp
from jax.experimental import pallas as pl
from jax.experimental.pallas import tpu as pltpu

RANK = 5  # fixed in the PyTorch module (__init__: self.rank = 5)


def _lmf_kernel(a_ref, v_ref, t_ref, w_ref, sf_ref, o_ref):
    """Low-rank fusion: 3 packed modality dots + triple product + rank-sum dot.

    a/v/t_ref : (TB, IN_SIZE)        raw activations (no ones column).
    w_ref     : (3, IN_SIZE+1, R*O)  packed per-modality factors; row IN_SIZE
                is the bias row (the row the implicit `1` would multiply);
                fusion_weights is pre-folded into modality 0.
    sf_ref    : (R*O + 1, O)         rank-sum matrix (tiled identity) with the
                fusion bias appended as its last row.
    o_ref     : (TB, O)
    """
    d = a_ref.shape[1]      # IN_SIZE
    ro = w_ref.shape[2]     # RANK * O

    def fuse(x_ref, m):
        return (jnp.dot(x_ref[...], w_ref[m, :d, :],
                        preferred_element_type=jnp.float32)
                + w_ref[m, d:d + 1, :])

    zy = fuse(a_ref, 0) * fuse(v_ref, 1) * fuse(t_ref, 2)        # (TB, R*O)
    out = (jnp.dot(zy, sf_ref[:ro, :], preferred_element_type=jnp.float32)
           + sf_ref[ro:ro + 1, :])
    o_ref[...] = out.astype(o_ref.dtype)


def _pack_params(params):
    """Fold fusion weights/bias into the factors and pack rank into lanes."""
    af = params["audio_factor"].astype(jnp.float32)
    vf = params["video_factor"].astype(jnp.float32)
    tf = params["text_factor"].astype(jnp.float32)
    fw = params["fusion_weights"].astype(jnp.float32).reshape(RANK)
    fb = params["fusion_bias"].astype(jnp.float32)
    rank, d1, o = af.shape

    # fold the (1, RANK) fusion weights into one factor (tiny, trace-time work)
    af = af * fw[:, None, None]

    def to2d(f):
        # (R, D1, O) -> (D1, R*O) with the bias (ones) row moved to the end
        f2 = jnp.transpose(f, (1, 0, 2)).reshape(d1, rank * o)
        return jnp.concatenate([f2[1:], f2[0:1]], axis=0)

    w = jnp.stack([to2d(af), to2d(vf), to2d(tf)], axis=0)       # (3, D1, R*O)
    s = jnp.tile(jnp.eye(o, dtype=jnp.float32), (rank, 1))      # (R*O, O)
    sf = jnp.concatenate([s, fb], axis=0)                       # (R*O + 1, O)
    return w, sf


def low_rank_forward(l1, a1, v1, params):
    """JAX wrapper matching low_rank.forward(l1, a1, v1)."""
    w, sf = _pack_params(params)
    B, in_size = a1.shape
    O = sf.shape[1]

    # Batch tiling: single block when B is small; 8-aligned tiles for large B
    # so the activation DMA pipelines and v7x can shard across its 2 TCs.
    # Tile sizes are KB-scale, so they fit v7x's 64 MiB VMEM with huge margin.
    TB = B
    for cand in (512, 256, 128):
        if B > cand and B % cand == 0:
            TB = cand
            break
    grid = (B // TB,)

    a1 = a1.astype(jnp.float32)
    v1 = v1.astype(jnp.float32)
    l1 = l1.astype(jnp.float32)

    act_spec = pl.BlockSpec((TB, in_size), lambda i: (i, 0))

    out = pl.pallas_call(
        _lmf_kernel,
        out_shape=jax.ShapeDtypeStruct((B, O), jnp.float32),
        grid=grid,
        in_specs=[
            act_spec,                                    # audio
            act_spec,                                    # video
            act_spec,                                    # text
            pl.BlockSpec(w.shape, lambda i: (0, 0, 0)),  # packed factors
            pl.BlockSpec(sf.shape, lambda i: (0, 0)),    # rank-sum + bias
        ],
        out_specs=pl.BlockSpec((TB, O), lambda i: (i, 0)),
        compiler_params=pltpu.CompilerParams(
            dimension_semantics=("parallel",)),
    )(a1, v1, l1, w, sf)

    # matches `output.view(-1, self.output_dim)`
    return out.reshape(-1, O)


def _xavier_normal(key, shape):
    """torch.nn.init.xavier_normal fan computation."""
    if len(shape) == 2:
        fan_in, fan_out = shape[1], shape[0]
    else:
        receptive = math.prod(shape[2:])
        fan_in = shape[1] * receptive
        fan_out = shape[0] * receptive
    std = math.sqrt(2.0 / (fan_in + fan_out))
    return std * jax.random.normal(key, shape, jnp.float32)


def _ref_forward(l1, a1, v1, params):
    """Pure-JAX reference of the PyTorch forward."""
    B = a1.shape[0]
    ones = jnp.ones((B, 1), jnp.float32)
    a_h = jnp.concatenate([ones, a1], axis=1)
    v_h = jnp.concatenate([ones, v1], axis=1)
    t_h = jnp.concatenate([ones, l1], axis=1)
    fa = jnp.einsum("bi,rio->rbo", a_h, params["audio_factor"])
    fv = jnp.einsum("bi,rio->rbo", v_h, params["video_factor"])
    ft = jnp.einsum("bi,rio->rbo", t_h, params["text_factor"])
    zy = fa * fv * ft  # (R, B, O)
    out = jnp.einsum("xr,rbo->bo", params["fusion_weights"], zy)
    out = out + params["fusion_bias"]
    return out.reshape(-1, params["fusion_bias"].shape[1])


if __name__ == "__main__":
    # Small, forward-consistent shapes.
    B = 4          # batch
    IN_SIZE = 16   # in_size
    OUT_DIM = 8    # output_dim
    D1 = IN_SIZE + 1
    # NOTE: hidden / dropout / LSTM / BatchNorm / post_fusion layers declared
    # in __init__ are unused by this forward path, so they are not materialized.

    key = jax.random.PRNGKey(0)
    (k_l, k_a, k_v, k_af, k_vf, k_tf, k_fw, k_fb) = jax.random.split(key, 8)

    params = {
        "audio_factor": _xavier_normal(k_af, (RANK, D1, OUT_DIM)),
        "video_factor": _xavier_normal(k_vf, (RANK, D1, OUT_DIM)),
        "text_factor": _xavier_normal(k_tf, (RANK, D1, OUT_DIM)),
        "fusion_weights": _xavier_normal(k_fw, (1, RANK)),
        "fusion_bias": _xavier_normal(k_fb, (1, OUT_DIM)),
    }

    l1 = jax.random.normal(k_l, (B, IN_SIZE), jnp.float32)
    a1 = jax.random.normal(k_a, (B, IN_SIZE), jnp.float32)
    v1 = jax.random.normal(k_v, (B, IN_SIZE), jnp.float32)

    fwd = jax.jit(low_rank_forward)
    y = jax.block_until_ready(fwd(l1, a1, v1, params))

    y_ref = jax.block_until_ready(_ref_forward(l1, a1, v1, params))
    assert y.shape == (B, OUT_DIM), y.shape
    assert jnp.allclose(y, y_ref, atol=2e-5, rtol=2e-5), (
        float(jnp.max(jnp.abs(y - y_ref))))

    print("KERNEL_OK")
</pallas_src>

<mosaic_0001>
module attributes {stable_mosaic.version = 11 : i64} {
  func.func @_lmf_kernel(%arg0: i32, %arg1: memref<4x16xf32, #tpu.memory_space<vmem>>, %arg2: memref<4x16xf32, #tpu.memory_space<vmem>>, %arg3: memref<4x16xf32, #tpu.memory_space<vmem>>, %arg4: memref<3x17x40xf32, #tpu.memory_space<vmem>>, %arg5: memref<41x8xf32, #tpu.memory_space<vmem>>, %arg6: memref<4x8xf32, #tpu.memory_space<vmem>>) attributes {dimension_semantics = [#tpu.dimension_semantics<parallel>], iteration_bounds = array<i64: 1>, scalar_prefetch = 0 : i64, scratch_operands = 0 : i64, tpu.core_type = #tpu.core_type<tc>, window_params = [{transform_indices = @transform_0, window_bounds = array<i64: 4, 16>}, {transform_indices = @transform_1, window_bounds = array<i64: 4, 16>}, {transform_indices = @transform_2, window_bounds = array<i64: 4, 16>}, {pipeline_mode = #tpu.pipeline_mode<synchronous>, transform_indices = @transform_3, window_bounds = array<i64: 3, 17, 40>}, {pipeline_mode = #tpu.pipeline_mode<synchronous>, transform_indices = @transform_4, window_bounds = array<i64: 41, 8>}, {transform_indices = @transform_5, window_bounds = array<i64: 4, 8>}]} {
    %c0 = arith.constant 0 : index
    %c0_0 = arith.constant 0 : index
    %0 = vector.load %arg1[%c0, %c0_0] : memref<4x16xf32, #tpu.memory_space<vmem>>, vector<4x16xf32>
    %c0_1 = arith.constant 0 : index
    %c0_2 = arith.constant 0 : index
    %c0_3 = arith.constant 0 : index
    %1 = vector.load %arg4[%c0_1, %c0_2, %c0_3] : memref<3x17x40xf32, #tpu.memory_space<vmem>>, vector<1x16x40xf32>
    %2 = vector.shape_cast %1 : vector<1x16x40xf32> to vector<16x40xf32>
    %cst = arith.constant dense<0.000000e+00> : vector<4x40xf32>
    %3 = tpu.matmul %0, %2, %cst {dimension_numbers = #tpu.dot_dimension_numbers<[1], [0], [0], [1], [0, 0, 1, 1], [], []>} : vector<4x16xf32>, vector<16x40xf32>, vector<4x40xf32> -> vector<4x40xf32>
    %c0_4 = arith.constant 0 : index
    %c16 = arith.constant 16 : index
    %c0_5 = arith.constant 0 : index
    %4 = vector.load %arg4[%c0_4, %c16, %c0_5] : memref<3x17x40xf32, #tpu.memory_space<vmem>>, vector<1x1x40xf32>
    %5 = vector.shape_cast %4 : vector<1x1x40xf32> to vector<1x40xf32>
    %6 = vector.broadcast %5 : vector<1x40xf32> to vector<4x40xf32>
    %7 = arith.addf %3, %6 : vector<4x40xf32>
    %c0_6 = arith.constant 0 : index
    %c0_7 = arith.constant 0 : index
    %8 = vector.load %arg2[%c0_6, %c0_7] : memref<4x16xf32, #tpu.memory_space<vmem>>, vector<4x16xf32>
    %c1 = arith.constant 1 : index
    %c0_8 = arith.constant 0 : index
    %c0_9 = arith.constant 0 : index
    %9 = vector.load %arg4[%c1, %c0_8, %c0_9] : memref<3x17x40xf32, #tpu.memory_space<vmem>>, vector<1x16x40xf32>
    %10 = vector.shape_cast %9 : vector<1x16x40xf32> to vector<16x40xf32>
    %cst_10 = arith.constant dense<0.000000e+00> : vector<4x40xf32>
    %11 = tpu.matmul %8, %10, %cst_10 {dimension_numbers = #tpu.dot_dimension_numbers<[1], [0], [0], [1], [0, 0, 1, 1], [], []>} : vector<4x16xf32>, vector<16x40xf32>, vector<4x40xf32> -> vector<4x40xf32>
    %c1_11 = arith.constant 1 : index
    %c16_12 = arith.constant 16 : index
    %c0_13 = arith.constant 0 : index
    %12 = vector.load %arg4[%c1_11, %c16_12, %c0_13] : memref<3x17x40xf32, #tpu.memory_space<vmem>>, vector<1x1x40xf32>
    %13 = vector.shape_cast %12 : vector<1x1x40xf32> to vector<1x40xf32>
    %14 = vector.broadcast %13 : vector<1x40xf32> to vector<4x40xf32>
    %15 = arith.addf %11, %14 : vector<4x40xf32>
    %16 = arith.mulf %7, %15 : vector<4x40xf32>
    %c0_14 = arith.constant 0 : index
    %c0_15 = arith.constant 0 : index
    %17 = vector.load %arg3[%c0_14, %c0_15] : memref<4x16xf32, #tpu.memory_space<vmem>>, vector<4x16xf32>
    %c2 = arith.constant 2 : index
    %c0_16 = arith.constant 0 : index
    %c0_17 = arith.constant 0 : index
    %18 = vector.load %arg4[%c2, %c0_16, %c0_17] : memref<3x17x40xf32, #tpu.memory_space<vmem>>, vector<1x16x40xf32>
    %19 = vector.shape_cast %18 : vector<1x16x40xf32> to vector<16x40xf32>
    %cst_18 = arith.constant dense<0.000000e+00> : vector<4x40xf32>
    %20 = tpu.matmul %17, %19, %cst_18 {dimension_numbers = #tpu.dot_dimension_numbers<[1], [0], [0], [1], [0, 0, 1, 1], [], []>} : vector<4x16xf32>, vector<16x40xf32>, vector<4x40xf32> -> vector<4x40xf32>
    %c2_19 = arith.constant 2 : index
    %c16_20 = arith.constant 16 : index
    %c0_21 = arith.constant 0 : index
    %21 = vector.load %arg4[%c2_19, %c16_20, %c0_21] : memref<3x17x40xf32, #tpu.memory_space<vmem>>, vector<1x1x40xf32>
    %22 = vector.shape_cast %21 : vector<1x1x40xf32> to vector<1x40xf32>
    %23 = vector.broadcast %22 : vector<1x40xf32> to vector<4x40xf32>
    %24 = arith.addf %20, %23 : vector<4x40xf32>
    %25 = arith.mulf %16, %24 : vector<4x40xf32>
    %c0_22 = arith.constant 0 : index
    %c0_23 = arith.constant 0 : index
    %26 = vector.load %arg5[%c0_22, %c0_23] : memref<41x8xf32, #tpu.memory_space<vmem>>, vector<40x8xf32>
    %cst_24 = arith.constant dense<0.000000e+00> : vector<4x8xf32>
    %27 = tpu.matmul %25, %26, %cst_24 {dimension_numbers = #tpu.dot_dimension_numbers<[1], [0], [0], [1], [0, 0, 1, 1], [], []>} : vector<4x40xf32>, vector<40x8xf32>, vector<4x8xf32> -> vector<4x8xf32>
    %c40 = arith.constant 40 : index
    %c0_25 = arith.constant 0 : index
    %28 = vector.load %arg5[%c40, %c0_25] : memref<41x8xf32, #tpu.memory_space<vmem>>, vector<1x8xf32>
    %29 = vector.broadcast %28 : vector<1x8xf32> to vector<4x8xf32>
    %30 = arith.addf %27, %29 : vector<4x8xf32>
    %c0_26 = arith.constant 0 : index
    %c0_27 = arith.constant 0 : index
    %31 = vector.load %arg6[%c0_26, %c0_27] : memref<4x8xf32, #tpu.memory_space<vmem>>, vector<4x8xf32>
    tpu.vector_store %arg6[%c0_26, %c0_27], %30 {strides = array<i32>} : memref<4x8xf32, #tpu.memory_space<vmem>>, vector<4x8xf32>,
    return
  }
  func.func @transform_0(%arg0: i32) -> (i32, i32) {
    %c0_i32 = arith.constant 0 : i32
    %c0_i32_0 = arith.constant 0 : i32
    return %arg0, %c0_i32 : i32, i32
  }
  func.func @transform_1(%arg0: i32) -> (i32, i32) {
    %c0_i32 = arith.constant 0 : i32
    %c0_i32_0 = arith.constant 0 : i32
    return %arg0, %c0_i32 : i32, i32
  }
  func.func @transform_2(%arg0: i32) -> (i32, i32) {
    %c0_i32 = arith.constant 0 : i32
    %c0_i32_0 = arith.constant 0 : i32
    return %arg0, %c0_i32 : i32, i32
  }
  func.func @transform_3(%arg0: i32) -> (i32, i32, i32) {
    %c0_i32 = arith.constant 0 : i32
    %c0_i32_0 = arith.constant 0 : i32
    %c0_i32_1 = arith.constant 0 : i32
    %c0_i32_2 = arith.constant 0 : i32
    return %c0_i32, %c0_i32_0, %c0_i32_1 : i32, i32, i32
  }
  func.func @transform_4(%arg0: i32) -> (i32, i32) {
    %c0_i32 = arith.constant 0 : i32
    %c0_i32_0 = arith.constant 0 : i32
    %c0_i32_1 = arith.constant 0 : i32
    return %c0_i32, %c0_i32_0 : i32, i32
  }
  func.func @transform_5(%arg0: i32) -> (i32, i32) {
    %c0_i32 = arith.constant 0 : i32
    %c0_i32_0 = arith.constant 0 : i32
    return %arg0, %c0_i32 : i32, i32
  }
}

</mosaic_0001>

<bundles_post_ra>
// kernel: low_rank_forward.1
= control target key start
LH: loop header
LB: loop body
LE: loop exit
PB: predicated region body
PF: predicated region fallthrough
CT: control target
= control target key end

     0   :  { %v475_v2 = vmov 0.0|0.0   ;;  %vm476_vm0 = vmmov 0   ;;  %v477_v4 = vmov 0.0   ;;  %vm29_vm1 = vcmask 130048   ;;  %s582_s0 = inlined_call_operand.vmem [shape: f32[4,16], index: 0, kind: input, shape index: {}]   ;;  %s583_s1 = inlined_call_operand.vmem [shape: f32[4,16], index: 1, kind: input, shape index: {}]   ;;  %s584_s2 = inlined_call_operand.vmem [shape: f32[4,16], index: 2, kind: input, shape index: {}]   ;;  %s585_s3 = inlined_call_operand.vmem [shape: f32[3,17,40], index: 3, kind: input, shape index: {}]   ;;  %s586_s4 = inlined_call_operand.vmem [shape: f32[41,8], index: 4, kind: input, shape index: {}]   ;;  %s587_s5 = inlined_call_operand.hbm [shape: f32[4,8], index: 5, kind: output, shape index: {}]  }
   0x1   :  { %v22_v0 = vld [vmem:[%s585_s3] sm:$0xff]  ;;  %v23_v1 = vld [vmem:[%s585_s3 + $0x8] sm:$0xff]  ;;  %432 = vmatprep.subr.bf16.mxu0 %v475_v2  ;;  %402 = vmatprep.mubr.msk.f32.mxu0 %vm476_vm0, %v477_v4  ;;  %v371_v5 = vld [vmem:[%s585_s3 + $0x18] sm:$0xff] }
   0x2   :  { %v433_v3 = vpack.c.bf16 %v23_v1, %v22_v0  ;;  %v372_v6 = vld [vmem:[%s585_s3 + $0x20] sm:$0xff]  ;;  %441 = vmatprep.subr.bf16.mxu1 %v475_v2  ;;  %429 = vmatprep.mubr.msk.f32.mxu1 %vm476_vm0, %v477_v4 }
   0x3   :  { %v21_v7 = vld [vmem:[%s582_s0] sm:$0xf]  ;;  %v436_v8 = vpack.c.bf16 %v372_v6, %v371_v5 }
   0x4   :  { %434 = vmatpush3.bf16.msra.mxu0 %v433_v3 }
   0x5   :  { %10 = vsyncpa [#allocation3], 0  ;;  %435 = vmatprep.subr.bf16.mxu0 %v475_v2  ;;  %v376_v9 = vld [vmem:[%s585_s3 + $0x30] sm:$0xff]  ;;  %v377_v10 = vld [vmem:[%s585_s3 + $0x38] sm:$0xff]  ;;  %vm279_vm2 = vcmask 326656   ;;  %s478_s26 = smov [#allocation2]  }
   0x6   :  { %v103_v11 = vld [vmem:[%s583_s1] sm:$0xf]  ;;  %v439_v12 = vpack.c.bf16 %v377_v10, %v376_v9  ;;  %v270_v15 = vld [vmem:[%s586_s4 + $0x8] sm:$0xff]  ;;  %v271_v17 = vld [vmem:[%s586_s4 + $0x10] sm:$0xff]  ;;  %s361_s27 = sshll.u32 %s478_s26, 4  ;;  %vm353_vm3 = vcmask 60416   ;;  %s362_s27 = int_to_ptr.vmem [resolvable:$true] %s361_s27 }
   0x7   :  { %403 = vmatmul.mubr.msk.f32.vlgmr.msra.gmra.mrb[0].mxu0 %vm29_vm1, %v21_v7  ;;  %v186_v13 = vld [vmem:[%s584_s2] sm:$0xf]  ;;  %v272_v18 = vld [vmem:[%s586_s4 + $0x18] sm:$0xff]  ;;  %v369_v23 = vld [vmem:[%s585_s3 + $0x10] ss:$0 sm:$0xff]  ;;  %p456_p1 = scmp.lt.s32.totalorder %s362_s27, %s362_s27 }
   0x8   :  { %437 = vmatpush3.bf16.msra.mxu0 %v436_v8  ;;  %409 = vmatprep.mubr.msk.f32.mxu0 %vm476_vm0, %v477_v4  ;;  %v269_v14 = vld [vmem:[%s586_s4] sm:$0xff]  ;;  %v445_v19 = vpack.c.bf16 %v272_v18, %v271_v17  ;;  %v374_v24 = vld [vmem:[%s585_s3 + $0x28] ss:$0 sm:$0xff] }
   0x9   :  { %438 = vmatprep.subr.bf16.mxu0 %v475_v2  ;;  %v442_v16 = vpack.c.bf16 %v270_v15, %v269_v14  ;;  %v273_v20 = vld [vmem:[%s586_s4 + $0x20] sm:$0xff]  ;;  %v381_v35 = vld [vmem:[%s586_s4 + $0x28] ss:$0 sm:$0xff] }
   0xa   :  { %v379_v29 = vld [vmem:[%s585_s3 + $0x40] ss:$0 sm:$0xff]  ;;  %s451_s3 = scalar_lea.vmem %s362_s27, 64 }
   0xb   :  { %410 = vmatmul.mubr.msk.f32.vlgmr.msra.gmra.mrb[2].mxu0 %vm29_vm1, %v103_v11  ;;  %443 = vmatpush3.bf16.msra.mxu1 %v442_v16  ;;  %p452_p0 = scmp.ne.s32.totalorder %s362_s27, %s451_s3  ;;  %p457_p2 = scmp.lt.s32.totalorder %s451_s3, %s451_s3 }
   0xc   :  { %440 = vmatpush3.bf16.msra.mxu0 %v439_v12  ;;  %416 = vmatprep.mubr.msk.f32.mxu0 %vm476_vm0, %v477_v4 }
   0xd   :  { %444 = vmatprep.subr.bf16.mxu1 %v475_v2  ;;  %p458_p3 = por %p457_p2, %p456_p1 }
   0xf   :  { %417 = vmatmul.mubr.msk.f32.vlgmr.msra.gmra.mrb[4].mxu0 %vm29_vm1, %v186_v13  ;;  %446 = vmatpush3.bf16.msra.mxu1 %v445_v19  ;;  %p459_p4 = pnand %p458_p3, %p452_p0 }
  0x10   :  { %427 = vmatprep.subr.mxu1 %v477_v4 }
  0x13   :  { %428 = vmatpush3.msra.mxu1 %v273_v20 }
  0xda   :  { %v99_v21 = vpop.f32.mrb[0].mxu0 }
  0xdb   :  { %v404_v22 = vpop.f32.mrb[1].mxu0  ;;  %v100_v26 = vadd.f32 %v369_v23, %v99_v21 }
  0xde   :  { %v181_v25 = vpop.f32.mrb[2].mxu0 }
  0xdf   :  { %v182_v27 = vadd.f32 %v374_v24, %v181_v25  ;;  %v411_v28 = vpop.f32.mrb[3].mxu0 }
  0xe1   :  { %v185_v30 = vmul.f32 %v182_v27, %v100_v26 }
  0xe2   :  { %v264_v31 = vpop.f32.mrb[4].mxu0 }
  0xe3   :  { %v265_v32 = vadd.f32 %v379_v29, %v264_v31  ;;  %v418_v33 = vpop.f32.mrb[5].mxu0 }
  0xe5   :  { %v268_v34 = vmul.f32 %v265_v32, %v185_v30 }
  0xe7   :  { %430 = vmatmul.mubr.msk.f32.vlgmr.msra.gmra.mrb[0].mxu1 %vm279_vm2, %v268_v34 }
 0x1ba   :  { %v349_v36 = vpop.f32.mrb[0].mxu1 }
 0x1bb   :  { %v350_v37 = vadd.f32 %v381_v35, %v349_v36  ;;  %v431_v38 = vpop.f32.mrb[1].mxu1 }
 0x1bd   :  { %354 = vst.msk [vmem:[#allocation2] sm:$0xf] %vm353_vm3, %v350_v37 }
 0x1be   :  { %462 = shalt.err (!%p459_p4)
}
 0x1bf   :  { %s463_s30 = scalar_lea.hbm %s587_s5, 64 }
 0x1c0   :  { %p464_p5 = scmp.ne.s32.totalorder %s587_s5, %s463_s30  ;;  %p467_p6 = scmp.lt.u32.totalorder %s463_s30, %s587_s5 }
 0x1c2   :  { %p469_p7 = pnand %p467_p6, %p464_p5 }
 0x1c4   :  { %472 = shalt.err (!%p469_p7)
}
 0x1c5   :  { %364 = dma.vmem_to_hbm [thread:$0]  %s362_s27, 64, %s587_s5, [#allocation3]  }
 0x1c6   :  { %473 = dma.done.wait [#allocation3], 64  }
 0x1c7   :  { %474 = vsyncadd [#allocation3], 4294967232 }
 0x1c8   :  { %368 = vsyncpa [#allocation3], 1 }

</bundles_post_ra>
